<compile_context>
chip_gen: v6e
topology: v6e:2x2x1
jax: 0.10.0
libtpu: 0.0.40
codegen_flags: <defaults>
</compile_context>

<pallas_src>
import jax
import jax.numpy as jnp
from jax.experimental import pallas as pl
from jax.experimental.pallas import tpu as pltpu

N = 256        # number of graph nodes
F_IN = 64      # input feature dim
F_OUT = 128    # output feature dim (lane-dense)
TILE_I = 128   # target-node rows per grid step (>=2 tiles -> megacore on v7x)
NEG_SLOPE = 0.2


def gat_kernel(sdst_ref, ssrc_ref, adj_ref, h_ref, out_ref):
    # Attention logits: broadcast add of precomputed per-node scores.  All
    # elementwise math in f32 (v5e-safe).
    e = sdst_ref[...] + ssrc_ref[...]                       # (T,1)+(1,N) -> (T,N)
    e = jnp.where(e > 0, e, NEG_SLOPE * e)                  # LeakyReLU, one select
    # Adjacency mask as an additive bias: edges -> +0, non-edges -> -1e30.
    e = e + (adj_ref[...].astype(jnp.float32) - 1.0) * jnp.float32(1e30)

    # Row softmax with deferred normalization: only exp + row-sum here; the
    # denominator is applied after the aggregation matmul (EUP approx recip).
    m = jnp.max(e, axis=-1, keepdims=True)                  # XLU lane reduce
    p = jnp.exp(e - m)                                      # (T,N) f32, EUP
    inv = pl.reciprocal(jnp.sum(p, axis=-1, keepdims=True),
                        approx=True)                        # (T,1)

    # Aggregate messages: bf16 operands, f32 accumulation on the MXU.
    agg = jnp.dot(p.astype(jnp.bfloat16), h_ref[...],
                  preferred_element_type=jnp.float32)       # (T, F_OUT)
    out_ref[...] = (agg * inv).astype(out_ref.dtype)


def gat_forward(x, edge_index, W, a_src, a_dst):
    """x:(N,F_IN) f32, edge_index:(2,E) i32 with rows (src, dst)."""
    n, _ = x.shape
    f_out = W.shape[1]
    src, dst = edge_index[0], edge_index[1]

    # Dense int8 adjacency: adj[i, j] = 1 iff edge j -> i exists; + self-loops.
    adj = jnp.zeros((n, n), jnp.int8).at[dst, src].set(1)
    adj = jnp.maximum(adj, jnp.eye(n, dtype=jnp.int8))

    # Hoisted (grid-invariant) work: node features h and score projections.
    h = x @ W                                                # (N, F_OUT) f32
    s_dst = h @ a_dst                                        # (N, 1) f32, per-row tile
    s_src_row = (h @ a_src).reshape(1, n)                    # (1, N) f32, lane-dense
    h_bf16 = h.astype(jnp.bfloat16)                          # MXU RHS for aggregation

    grid = (n // TILE_I,)

    cost = pl.CostEstimate(
        flops=2 * n * n * f_out + 8 * n * n,                 # agg matmul + elementwise
        transcendentals=n * n + n,                           # exp + reciprocal
        bytes_accessed=n * n                                 # adj int8
        + n * f_out * 2                                      # h bf16
        + 2 * n * 4                                          # scores f32
        + n * f_out * 4,                                     # output f32
    )

    return pl.pallas_call(
        gat_kernel,
        out_shape=jax.ShapeDtypeStruct((n, f_out), jnp.float32),
        grid=grid,
        in_specs=[
            pl.BlockSpec((TILE_I, 1), lambda i: (i, 0)),     # s_dst rows of this tile
            pl.BlockSpec((1, n), lambda i: (0, 0)),          # s_src, lane-dense row
            pl.BlockSpec((TILE_I, n), lambda i: (i, 0)),     # adjacency rows (int8)
            pl.BlockSpec((n, f_out), lambda i: (0, 0)),      # h (bf16), resident
        ],
        out_specs=pl.BlockSpec((TILE_I, f_out), lambda i: (i, 0)),
        compiler_params=pltpu.CompilerParams(
            dimension_semantics=("parallel",),
            # NOTE: set vmem_limit_bytes explicitly when scaling N (v5e scoped
            # default 16 MiB, v6e/v7x 32 MiB); unnecessary at N=256.
        ),
        cost_estimate=cost,
    )(s_dst, s_src_row, adj, h_bf16)


def reference_gat(x, edge_index, W, a_src, a_dst):
    n = x.shape[0]
    src, dst = edge_index[0], edge_index[1]
    adj = jnp.zeros((n, n), jnp.float32).at[dst, src].set(1.0)
    adj = jnp.maximum(adj, jnp.eye(n, dtype=jnp.float32))
    h = x @ W
    s_src = h @ a_src
    s_dst = h @ a_dst
    e = s_dst + s_src.T
    e = jnp.where(e > 0, e, NEG_SLOPE * e)
    e = jnp.where(adj > 0, e, -1e30)
    alpha = jax.nn.softmax(e, axis=-1)
    return alpha @ h


if __name__ == "__main__":
    key = jax.random.PRNGKey(0)
    kx, ke, kw, ks, kd = jax.random.split(key, 5)

    # deterministic synthetic inputs / parameters
    x = jax.random.normal(kx, (N, F_IN), dtype=jnp.float32)
    E = 2048
    edge_index = jax.random.randint(ke, (2, E), 0, N, dtype=jnp.int32)
    W = jax.random.normal(kw, (F_IN, F_OUT), dtype=jnp.float32) * 0.1
    a_src = jax.random.normal(ks, (F_OUT, 1), dtype=jnp.float32) * 0.1
    a_dst = jax.random.normal(kd, (F_OUT, 1), dtype=jnp.float32) * 0.1

    out = gat_forward(x, edge_index, W, a_src, a_dst)
    out = jax.block_until_ready(out)

    ref = reference_gat(x, edge_index, W, a_src, a_dst)
    assert out.shape == (N, F_OUT)
    # Tolerance: aggregation MXU operands are bf16 (f32 accumulation) and the
    # softmax denominator uses the EUP approx reciprocal (~2^-12 rel error).
    assert jnp.allclose(out, ref, atol=5e-2, rtol=5e-2)

    print("KERNEL_OK")
</pallas_src>

<mosaic_0001>
module attributes {stable_mosaic.version = 11 : i64} {
  func.func @gat_kernel(%arg0: i32, %arg1: memref<128x1xf32, #tpu.memory_space<vmem>>, %arg2: memref<1x256xf32, #tpu.memory_space<vmem>>, %arg3: memref<128x256xi8, #tpu.memory_space<vmem>>, %arg4: memref<256x128xbf16, #tpu.memory_space<vmem>>, %arg5: memref<128x128xf32, #tpu.memory_space<vmem>>) attributes {dimension_semantics = [#tpu.dimension_semantics<parallel>], iteration_bounds = array<i64: 2>, scalar_prefetch = 0 : i64, scratch_operands = 0 : i64, tpu.core_type = #tpu.core_type<tc>, window_params = [{transform_indices = @transform_0, window_bounds = array<i64: 128, 1>}, {pipeline_mode = #tpu.pipeline_mode<synchronous>, transform_indices = @transform_1, window_bounds = array<i64: 1, 256>}, {transform_indices = @transform_2, window_bounds = array<i64: 128, 256>}, {pipeline_mode = #tpu.pipeline_mode<synchronous>, transform_indices = @transform_3, window_bounds = array<i64: 256, 128>}, {transform_indices = @transform_4, window_bounds = array<i64: 128, 128>}]} {
    %c0 = arith.constant 0 : index
    %c0_0 = arith.constant 0 : index
    %0 = vector.load %arg1[%c0, %c0_0] : memref<128x1xf32, #tpu.memory_space<vmem>>, vector<128x1xf32>
    %c0_1 = arith.constant 0 : index
    %c0_2 = arith.constant 0 : index
    %1 = vector.load %arg2[%c0_1, %c0_2] : memref<1x256xf32, #tpu.memory_space<vmem>>, vector<1x256xf32>
    %2 = vector.broadcast %0 : vector<128x1xf32> to vector<128x256xf32>
    %3 = vector.broadcast %1 : vector<1x256xf32> to vector<128x256xf32>
    %4 = arith.addf %2, %3 : vector<128x256xf32>
    %cst = arith.constant 0.000000e+00 : f32
    %5 = vector.broadcast %cst : f32 to vector<128x256xf32>
    %6 = arith.cmpf ogt, %4, %5 : vector<128x256xf32>
    %cst_3 = arith.constant 2.000000e-01 : f32
    %7 = vector.broadcast %cst_3 : f32 to vector<128x256xf32>
    %8 = arith.mulf %7, %4 : vector<128x256xf32>
    %9 = arith.select %6, %4, %8 : vector<128x256xi1>, vector<128x256xf32>
    %c0_4 = arith.constant 0 : index
    %c0_5 = arith.constant 0 : index
    %10 = vector.load %arg3[%c0_4, %c0_5] : memref<128x256xi8, #tpu.memory_space<vmem>>, vector<128x256xi8>
    %11 = arith.sitofp %10 : vector<128x256xi8> to vector<128x256xf32>
    %cst_6 = arith.constant 1.000000e+00 : f32
    %12 = vector.broadcast %cst_6 : f32 to vector<128x256xf32>
    %13 = arith.subf %11, %12 : vector<128x256xf32>
    %cst_7 = arith.constant 1.000000e+30 : f32
    %14 = vector.broadcast %cst_7 : f32 to vector<128x256xf32>
    %15 = arith.mulf %13, %14 : vector<128x256xf32>
    %16 = arith.addf %9, %15 : vector<128x256xf32>
    %cst_8 = arith.constant dense<0xFF800000> : vector<128xf32>
    %17 = vector.multi_reduction <maximumf>, %16, %cst_8 [1] : vector<128x256xf32> to vector<128xf32>
    %18 = vector.shape_cast %17 : vector<128xf32> to vector<128x1xf32>
    %19 = vector.broadcast %18 : vector<128x1xf32> to vector<128x256xf32>
    %20 = arith.subf %16, %19 : vector<128x256xf32>
    %21 = math.exp %20 : vector<128x256xf32>
    %cst_9 = arith.constant dense<0.000000e+00> : vector<128xf32>
    %22 = vector.multi_reduction <add>, %21, %cst_9 [1] : vector<128x256xf32> to vector<128xf32>
    %23 = vector.shape_cast %22 : vector<128xf32> to vector<128x1xf32>
    %24 = tpu.reciprocal %23 {approx = true} : vector<128x1xf32> -> vector<128x1xf32>
    %25 = arith.truncf %21 : vector<128x256xf32> to vector<128x256xbf16>
    %c0_10 = arith.constant 0 : index
    %c0_11 = arith.constant 0 : index
    %26 = vector.load %arg4[%c0_10, %c0_11] : memref<256x128xbf16, #tpu.memory_space<vmem>>, vector<256x128xbf16>
    %cst_12 = arith.constant dense<0.000000e+00> : vector<128x128xf32>
    %27 = tpu.matmul %25, %26, %cst_12 {dimension_numbers = #tpu.dot_dimension_numbers<[1], [0], [0], [1], [0, 0, 1, 1], [], []>} : vector<128x256xbf16>, vector<256x128xbf16>, vector<128x128xf32> -> vector<128x128xf32>
    %28 = vector.broadcast %24 : vector<128x1xf32> to vector<128x128xf32>
    %29 = arith.mulf %27, %28 : vector<128x128xf32>
    %c0_13 = arith.constant 0 : index
    %c0_14 = arith.constant 0 : index
    %30 = vector.load %arg5[%c0_13, %c0_14] : memref<128x128xf32, #tpu.memory_space<vmem>>, vector<128x128xf32>
    tpu.vector_store %arg5[%c0_13, %c0_14], %29 {strides = array<i32>} : memref<128x128xf32, #tpu.memory_space<vmem>>, vector<128x128xf32>,
    return
  }
  func.func @transform_0(%arg0: i32) -> (i32, i32) {
    %c0_i32 = arith.constant 0 : i32
    %c0_i32_0 = arith.constant 0 : i32
    return %arg0, %c0_i32 : i32, i32
  }
  func.func @transform_1(%arg0: i32) -> (i32, i32) {
    %c0_i32 = arith.constant 0 : i32
    %c0_i32_0 = arith.constant 0 : i32
    %c0_i32_1 = arith.constant 0 : i32
    return %c0_i32, %c0_i32_0 : i32, i32
  }
  func.func @transform_2(%arg0: i32) -> (i32, i32) {
    %c0_i32 = arith.constant 0 : i32
    %c0_i32_0 = arith.constant 0 : i32
    return %arg0, %c0_i32 : i32, i32
  }
  func.func @transform_3(%arg0: i32) -> (i32, i32) {
    %c0_i32 = arith.constant 0 : i32
    %c0_i32_0 = arith.constant 0 : i32
    %c0_i32_1 = arith.constant 0 : i32
    return %c0_i32, %c0_i32_0 : i32, i32
  }
  func.func @transform_4(%arg0: i32) -> (i32, i32) {
    %c0_i32 = arith.constant 0 : i32
    %c0_i32_0 = arith.constant 0 : i32
    return %arg0, %c0_i32 : i32, i32
  }
}

</mosaic_0001>

<bundles_post_ra>
// kernel: tpu_custom_call.1
= control target key start
LH: loop header
LB: loop body
LE: loop exit
PB: predicated region body
PF: predicated region fallthrough
CT: control target
= control target key end

     0   :  { %9 = vsyncpa [#allocation3], 0  ;;  %s2247_s0 = inlined_call_operand.vmem [shape: f32[256,1], index: 0, kind: input, shape index: {}]   ;;  %s2248_s1 = inlined_call_operand.vmem [shape: f32[1,256], index: 1, kind: input, shape index: {}]   ;;  %s2249_s2 = inlined_call_operand.vmem [shape: s8[256,256], index: 2, kind: input, shape index: {}]   ;;  %s2250_s3 = inlined_call_operand.vmem [shape: bf16[256,128], index: 3, kind: input, shape index: {}]   ;;  %s2251_s4 = inlined_call_operand.hbm [shape: f32[256,128], index: 4, kind: output, shape index: {}]  }
   0x1   :  { %11 = vsyncpa [#allocation3 + $0x1], 0  ;;  %s1590_s15 = smov 0   ;;  %s1592_s16 = smov 0  }
   0x2   :  { %s1594_s17 = smov 0   ;;  %s1596_s18 = smov 0  }
   0x3 LB: > { %s1611_s19 = sadd.s32 4294967295, %s1559_s18   ;;  %s1198_s20 = sadd.s32 4294967294, %s1559_s18   ;;  %s1559_s18 = sphi %s1596_s18, %s2278_s18   ;;  %s1555_s17 = sphi %s1594_s17, %s2277_s17   ;;  %s1551_s16 = sphi %s1592_s16, %s2276_s16   ;;  %s1547_s15 = sphi %s1590_s15, %s2275_s15  }
   0x4   : > { %s1615_s21 = sadd.s32 1, %s1559_s18   ;;  %s118_s22 = sadd.s32 1, %s1555_s17 }
   0x5   : > { %s115_s23 = ssub.s32 %s1559_s18, %s1615_s21  ;;  %p128_p0 = scmp.ne.s32.totalorder %s1555_s17, %s1551_s16 }
   0x6   : > { %p116_p1 = scmp.eq.s32.totalorder %s115_s23, 0  ;;  %p129_p2 = scmp.eq.s32.totalorder %s1611_s19, 1 }
   0x7   : > { %p134_p3 = scmp.ne.s32.totalorder %s1551_s16, %s1547_s15  ;;  %p135_p4 = scmp.eq.s32.totalorder %s1198_s20, 1 }
   0x8   : > { %s1626_s24 = scalar_select %p116_p1, %s1555_s17, %s118_s22  }
   0x9   : > { %p1628_p5 = por %p129_p2, %p128_p0  ;;  %p1632_p6 = por %p135_p4, %p134_p3 }
   0xa   : > { %p1201_p7 = scmp.ge.s32.totalorder %s1559_s18, 1  ;;  %p178_p8 = scmp.lt.s32.totalorder %s1559_s18, 3 }
   0xc   : > { %p179_p9 = pnand %p1201_p7, %p178_p8 }
   0xe   : > { %182 = sbr.rel (%p179_p9) target bundleno = 582 (0x246), region = 36 }
  0x13   : > { %s1203_s27 = sshll.u32 %s1611_s19, 4  ;;  %v1561_v0 = vmov 0   ;;  %v1387_v17 = vld [vmem:[%s2250_s3 + $0x78] sm:$0xff]   ;;  %v1389_v19 = vld [vmem:[%s2250_s3 + $0x70] sm:$0xff]   ;;  %s1205_s14 = sshll.u32 %s1611_s19, 2  ;;  %v323_v21 = vlaneseq }
  0x14   : > { %1386 = vset.pattern.permute.xlu1 %v1561_v0  ;;  %1385 = vset.pattern.permute.xlu0 %v1561_v0  ;;  %p211_p10 = scmp.lt.s32.totalorder %s1203_s27, 31  ;;  %v1388_v18 = vld [vmem:[%s2250_s3 + $0x38] sm:$0xff]   ;;  %v1390_v20 = vld [vmem:[%s2250_s3 + $0x30] sm:$0xff]   ;;  %p217_p11 = scmp.lt.s32.totalorder %s1205_s14, 7  ;;  %v1670_v39 = vld [vmem:[%s2248_s1] sm:$0x3] }
  0x15   : > { %1263 = vmatprep.subr.bf16.mxu0 %v1387_v17  ;;  %1327 = vmatprep.subr.bf16.mxu1 %v1387_v17  ;;  %v1663_v25 = vshrl.u32 %v323_v21, 7  ;;  %s207_s11 = sand.u32 1, %s1551_s16   ;;  %s1562_s29 = smov [#allocation2]  }
  0x16   : > { %s2280_s27 = smov (!%p211_p10, %s1203_s27), 31  ;;  %1264 = vmatpush3.bf16.msra.mxu0 %v1388_v18  ;;  %1335 = vmatpush3.bf16.msra.mxu1 %v1388_v18  ;;  %s2282_s14 = smov (!%p217_p11, %s1205_s14), 7 }
  0x17   : > { %s1204_s28 = sshll.u32 %s2280_s27, 3  ;;  %1265 = vmatprep.subr.bf16.mxu0 %v1389_v19  ;;  %1328 = vmatprep.subr.bf16.mxu1 %v1389_v19  ;;  %s1261_s20 = sshll.u32 %s2282_s14, 4  ;;  %v325_v35 = vsub.s32 0, %v1663_v25  ;;  %v329_v44 = vsub.s32 1, %v1663_v25 }
  0x18   : > { %s214_s5 = scalar_lea.vmem %s2247_s0, %s1204_s28  ;;  %s1658_s27 = scalar_lea.vmem %s2249_s2, %s1261_s20 }
  0x19   : > { %v233_v1 = vld [vmem:[%s214_s5 + $0x40] sm:$0xff]  ;;  %v234_v3 = vld [vmem:[%s214_s5 + $0x48] sm:$0xff]  ;;  %v228_v5 = vld [vmem:[%s214_s5 + $0x18] sm:$0xff]  ;;  %v1674_v48 = vrot.slane %v1670_v39, %v325_v35  ;;  %s1202_s12 = sshll.u32 %s207_s11, 7  ;;  %s1262_s14 = sshll.u32 %s1611_s19, 11 }
  0x1a   : > { %v225_v2 = vld [vmem:[%s214_s5] sm:$0xff]  ;;  %284 = vperm.xlu1 %1386, %v233_v1   ;;  %v226_v4 = vld [vmem:[%s214_s5 + $0x8] sm:$0xff]  ;;  %v227_v6 = vld [vmem:[%s214_s5 + $0x10] sm:$0xff]  ;;  %1266 = vmatpush3.bf16.msra.mxu0 %v1390_v20  ;;  %s2177_s13 = scalar_lea.vmem [#allocation2], %s1202_s12  ;;  %s2207_s19 = scalar_lea.sflag [#allocation3], %s207_s11 }
  0x1b   : > { %244 = vperm.xlu0 %1385, %v225_v2   ;;  %v236_v7 = vld [vmem:[%s214_s5 + $0x58] sm:$0xff]  ;;  %v235_v8 = vld [vmem:[%s214_s5 + $0x50] sm:$0xff]  ;;  %v230_v9 = vld [vmem:[%s214_s5 + $0x28] sm:$0xff]  ;;  %1336 = vmatpush3.bf16.msra.mxu1 %v1390_v20  ;;  %s1124_s20 = sshll.u32 %s2177_s13, 4  ;;  %s1503_s30 = sshll.u32 %s1562_s29, 4  ;;  %s2202_s20 = int_to_ptr.vmem [resolvable:$true] %s1124_s20  ;;  %s1504_s30 = int_to_ptr.vmem [resolvable:$false] %s1503_s30 }
  0x1c   : > { %v229_v10 = vld [vmem:[%s214_s5 + $0x20] sm:$0xff]  ;;  %v238_v11 = vld [vmem:[%s214_s5 + $0x68] sm:$0xff]  ;;  %v232_v13 = vld [vmem:[%s214_s5 + $0x38] sm:$0xff]  ;;  %s1499_s28 = scalar_lea.vmem %s2202_s20, 2048  ;;  %p1506_p1 = scmp.lt.s32.totalorder %s2202_s20, %s1504_s30 }
  0x1d   : > { %v237_v12 = vld [vmem:[%s214_s5 + $0x60] sm:$0xff]  ;;  %v231_v14 = vld [vmem:[%s214_s5 + $0x30] sm:$0xff]  ;;  %v240_v15 = vld [vmem:[%s214_s5 + $0x78] sm:$0xff]  ;;  %p1500_p12 = scmp.ne.s32.totalorder %s2202_s20, %s1499_s28 }
  0x1e   : > { %289 = vperm.xlu1 %1386, %v234_v3   ;;  %v239_v16 = vld [vmem:[%s214_s5 + $0x70] sm:$0xff]  ;;  %v461_v22 = vld [vmem:[%s1658_s27] sm:$0xff]  ;;  %v462_v23 = vld [vmem:[%s1658_s27 + $0x8] sm:$0xff]  ;;  %s1505_s5 = scalar_lea.vmem %s1504_s30, 4096 }
  0x1f   : > { %249 = vperm.xlu0 %1385, %v226_v4   ;;  %v465_v24 = vld [vmem:[%s1658_s27 + $0x20] sm:$0xff]  ;;  %v469_v26 = vunpack.c.0.s8 %v461_v22  ;;  %v470_v27 = vunpack.c.0.s8 %v462_v23  ;;  %v466_v28 = vld [vmem:[%s1658_s27 + $0x28] sm:$0xff]  ;;  %v471_v29 = vunpack.c.1.s8 %v461_v22  ;;  %v472_v31 = vunpack.c.1.s8 %v462_v23  ;;  %v1677_v0 = vld [vmem:[%s1658_s27 + $0x10] sm:$0xff]  ;;  %p1501_p13 = pnand %p1500_p12, %p1628_p5  ;;  %p1507_p2 = scmp.lt.s32.totalorder %s1505_s5, %s1499_s28 }
  0x20   : > { %v485_v30 = vunpack.c.0.s8 %v465_v24  ;;  %v486_v32 = vunpack.c.0.s8 %v466_v28  ;;  %v487_v33 = vunpack.c.1.s8 %v465_v24  ;;  %v488_v34 = vunpack.c.1.s8 %v466_v28 }
  0x21   : > { %v501_v36 = vcvt.s32.f32 %v469_v26  ;;  %v502_v37 = vcvt.s32.f32 %v470_v27  ;;  %v503_v38 = vcvt.s32.f32 %v471_v29  ;;  %v473_v41 = vunpack.c.2.s8 %v461_v22  ;;  %p1502_p0 = pneg %p1501_p13  ;;  %p1508_p3 = por %p1507_p2, %p1506_p1 }
  0x22   : > { %259 = vperm.xlu1 %1386, %v228_v5   ;;  %v517_v40 = vcvt.s32.f32 %v485_v30  ;;  %v504_v42 = vcvt.s32.f32 %v472_v31  ;;  %v474_v43 = vunpack.c.2.s8 %v462_v23  ;;  %v518_v45 = vcvt.s32.f32 %v486_v32 }
  0x23   : > { %254 = vperm.xlu0 %1385, %v227_v6   ;;  %v519_v46 = vcvt.s32.f32 %v487_v33  ;;  %v520_v47 = vcvt.s32.f32 %v488_v34  ;;  %v1208_v49 = vadd.f32 -1.0, %v501_v36  ;;  %v1209_v50 = vadd.f32 -1.0, %v502_v37  ;;  %p1509_p4 = pnand %p1508_p3, %p1502_p0 }
  0x24   : > { %v1210_v51 = vadd.f32 -1.0, %v503_v38  ;;  %v1224_v52 = vadd.f32 -1.0, %v517_v40  ;;  %v505_v53 = vcvt.s32.f32 %v473_v41  ;;  %v475_v54 = vunpack.c.3.s8 %v461_v22  ;;  %v1701_v22 = vld [vmem:[%s1658_s27 + $0x30] sm:$0xff] }
  0x25   : > { %v476_v55 = vunpack.c.3.s8 %v462_v23  ;;  %v1211_v56 = vadd.f32 -1.0, %v504_v42  ;;  %v506_v57 = vcvt.s32.f32 %v474_v43  ;;  %v489_v58 = vunpack.c.2.s8 %v465_v24  ;;  %v1704_v23 = vld [vmem:[%s1658_s27 + $0x38] sm:$0xff] }
  0x26   : > { %299 = vperm.xlu1 %1386, %v236_v7   ;;  %v490_v59 = vunpack.c.2.s8 %v466_v28  ;;  %v1225_v60 = vadd.f32 -1.0, %v518_v45  ;;  %v1226_v61 = vadd.f32 -1.0, %v519_v46  ;;  %v1227_v62 = vadd.f32 -1.0, %v520_v47 }
  0x27   : > { %294 = vperm.xlu0 %1385, %v235_v8   ;;  %v491_v63 = vunpack.c.3.s8 %v465_v24  ;;  %v1679_v1 = vmul.f32 1e+30, %v1208_v49  ;;  %v1681_v2 = vmul.f32 1e+30, %v1209_v50  ;;  %v1683_v3 = vmul.f32 1e+30, %v1210_v51 }
  0x28   : > { %v492_v4 = vunpack.c.3.s8 %v466_v28  ;;  %v1685_v5 = vmul.f32 1e+30, %v1224_v52  ;;  %v1212_v6 = vadd.f32 -1.0, %v505_v53  ;;  %v507_v7 = vcvt.s32.f32 %v475_v54 }
  0x29   : > { %v508_v8 = vcvt.s32.f32 %v476_v55  ;;  %v523_v17 = vcvt.s32.f32 %v491_v63  ;;  %v479_v20 = vunpack.c.1.s8 %v1677_v0  ;;  %v1706_v24 = vmul.f32 1e+30, %v1227_v62 }
  0x2a   : > { %269 = vperm.xlu1 %1386, %v230_v9   ;;  %v1688_v9 = vld [vmem:[%s1658_s27 + $0x18] sm:$0xff]  ;;  %v524_v18 = vcvt.s32.f32 %v492_v4  ;;  %v1708_v26 = vmul.f32 1e+30, %v1212_v6  ;;  %v1214_v27 = vadd.f32 -1.0, %v507_v7  ;;  %v493_v34 = vunpack.c.0.s8 %v1701_v22  ;;  %s2200_s27 = scalar_lea.hbm %s2251_s4, %s1262_s14 }
  0x2b   : > { %264 = vperm.xlu0 %1385, %v229_v10   ;;  %v1213_v10 = vadd.f32 -1.0, %v506_v57  ;;  %v478_v19 = vunpack.c.0.s8 %v1688_v9  ;;  %v480_v21 = vunpack.c.1.s8 %v1688_v9  ;;  %v1215_v28 = vadd.f32 -1.0, %v508_v8 }
  0x2c   : > { %v1230_v33 = vadd.f32 -1.0, %v523_v17  ;;  %v494_v35 = vunpack.c.0.s8 %v1704_v23  ;;  %v495_v36 = vunpack.c.1.s8 %v1701_v22  ;;  %v1231_v37 = vadd.f32 -1.0, %v524_v18 }
  0x2d   : > { %v1710_v29 = vmul.f32 1e+30, %v1213_v10  ;;  %v510_v38 = vcvt.s32.f32 %v478_v19  ;;  %v511_v40 = vcvt.s32.f32 %v479_v20  ;;  %v512_v41 = vcvt.s32.f32 %v480_v21 }
  0x2e   : > { %309 = vperm.xlu1 %1386, %v238_v11   ;;  %v521_v11 = vcvt.s32.f32 %v489_v58  ;;  %v1715_v42 = vmul.f32 1e+30, %v1214_v27  ;;  %v1717_v43 = vmul.f32 1e+30, %v1215_v28  ;;  %v496_v45 = vunpack.c.1.s8 %v1704_v23 }
  0x2f   : > { %304 = vperm.xlu0 %1385, %v237_v12   ;;  %v522_v12 = vcvt.s32.f32 %v490_v59  ;;  %v481_v46 = vunpack.c.2.s8 %v1677_v0  ;;  %v482_v51 = vunpack.c.2.s8 %v1688_v9  ;;  %v1726_v52 = vmul.f32 1e+30, %v1230_v33 }
  0x30   : > { %v1228_v30 = vadd.f32 -1.0, %v521_v11  ;;  %v525_v53 = vcvt.s32.f32 %v493_v34  ;;  %v526_v54 = vcvt.s32.f32 %v494_v35  ;;  %v527_v55 = vcvt.s32.f32 %v495_v36 }
  0x31   : > { %v1229_v31 = vadd.f32 -1.0, %v522_v12  ;;  %v1217_v57 = vadd.f32 -1.0, %v510_v38  ;;  %v1218_v58 = vadd.f32 -1.0, %v511_v40  ;;  %v1219_v59 = vadd.f32 -1.0, %v512_v41 }
  0x32   : > { %279 = vperm.xlu1 %1386, %v232_v13   ;;  %v477_v13 = vunpack.c.0.s8 %v1677_v0  ;;  %v1721_v47 = vmul.f32 1e+30, %v1228_v30  ;;  %v483_v62 = vunpack.c.3.s8 %v1677_v0  ;;  %v484_v63 = vunpack.c.3.s8 %v1688_v9 }
  0x33   : > { %274 = vperm.xlu0 %1385, %v231_v14   ;;  %v1691_v14 = vmul.f32 1e+30, %v1225_v60  ;;  %v1723_v49 = vmul.f32 1e+30, %v1229_v31  ;;  %v528_v60 = vcvt.s32.f32 %v496_v45  ;;  %v514_v6 = vcvt.s32.f32 %v482_v51 }
  0x34   : > { %v509_v32 = vcvt.s32.f32 %v477_v13  ;;  %v497_v7 = vunpack.c.2.s8 %v1701_v22  ;;  %v498_v8 = vunpack.c.2.s8 %v1704_v23  ;;  %v1232_v10 = vadd.f32 -1.0, %v525_v53 }
  0x35   : > { %v1233_v11 = vadd.f32 -1.0, %v526_v54  ;;  %v1234_v12 = vadd.f32 -1.0, %v527_v55  ;;  %v499_v13 = vunpack.c.3.s8 %v1701_v22  ;;  %v1740_v17 = vrot.slane %v1670_v39, %v329_v44 }
  0x36   : > { %319 = vperm.xlu1 %1386, %v240_v15   ;;  %v1693_v15 = vmul.f32 1e+30, %v1211_v56  ;;  %v1216_v50 = vadd.f32 -1.0, %v509_v32  ;;  %v1728_v56 = vmul.f32 1e+30, %v1231_v37  ;;  %v1235_v19 = vadd.f32 -1.0, %v528_v60 }
  0x37   : > { %314 = vperm.xlu0 %1385, %v239_v16   ;;  %v1695_v16 = vmul.f32 1e+30, %v1226_v61  ;;  %v513_v61 = vcvt.s32.f32 %v481_v46  ;;  %v1742_v0 = vmul.f32 1e+30, %v1217_v57  ;;  %v1744_v9 = vmul.f32 1e+30, %v1218_v58 }
  0x38   : > { %v1732_v4 = vmul.f32 1e+30, %v1216_v50  ;;  %v1746_v18 = vmul.f32 1e+30, %v1219_v59  ;;  %v515_v21 = vcvt.s32.f32 %v483_v62  ;;  %v516_v27 = vcvt.s32.f32 %v484_v63 }
  0x39   : > { %v1220_v20 = vadd.f32 -1.0, %v513_v61  ;;  %v1221_v28 = vadd.f32 -1.0, %v514_v6  ;;  %v529_v30 = vcvt.s32.f32 %v497_v7  ;;  %v530_v31 = vcvt.s32.f32 %v498_v8 }
  0x3a   : > { %v500_v22 = vunpack.c.3.s8 %v1704_v23  ;;  %v1749_v33 = vmul.f32 1e+30, %v1232_v10  ;;  %v1751_v39 = vmul.f32 1e+30, %v1233_v11  ;;  %v1753_v44 = vmul.f32 1e+30, %v1234_v12 }
  0x3b   : > { %v531_v34 = vcvt.s32.f32 %v499_v13  ;;  %v1759_v40 = vmul.f32 1e+30, %v1235_v19  ;;  %v1761_v23 = vmul.f32 1e+30, %v1220_v20  ;;  %v1222_v41 = vadd.f32 -1.0, %v515_v21 }
  0x3c   : > { %v1223_v45 = vadd.f32 -1.0, %v516_v27  ;;  %v1763_v46 = vmul.f32 1e+30, %v1221_v28  ;;  %v1236_v50 = vadd.f32 -1.0, %v529_v30  ;;  %v1237_v51 = vadd.f32 -1.0, %v530_v31 }
  0x3d   : > { %v532_v53 = vcvt.s32.f32 %v500_v22  ;;  %v1238_v62 = vadd.f32 -1.0, %v531_v34  ;;  %v1770_v10 = vmul.f32 1e+30, %v1222_v41 }
  0x3e   : > { %v1772_v11 = vmul.f32 1e+30, %v1223_v45  ;;  %v1775_v20 = vmul.f32 1e+30, %v1236_v50  ;;  %v1777_v21 = vmul.f32 1e+30, %v1237_v51 }
  0x3f   : > { %v1779_v27 = vadd.f32 -1.0, %v532_v53  ;;  %v1782_v31 = vmul.f32 1e+30, %v1238_v62 }
  0x95   : > { %v285_v32 = vpop.permute.xlu1 %284 }
  0x96   : > { %v245_v25 = vpop.permute.xlu0 %244  ;;  %v349_v35 = vadd.f32 %v1674_v48, %v285_v32  ;;  %v350_v36 = vadd.f32 %v1740_v17, %v285_v32 }
  0x97   : > { %v333_v37 = vadd.f32 %v1674_v48, %v245_v25  ;;  %v334_v38 = vadd.f32 %v1740_v17, %v245_v25 }
  0x98   : > { %v413_v59 = vmul.f32 0.2, %v349_v35  ;;  %v414_v60 = vmul.f32 0.2, %v350_v36  ;;  %vm381_vm2 = vcmp.gt.f32.partialorder %v349_v35, 0.0  ;;  %vm382_vm3 = vcmp.gt.f32.partialorder %v350_v36, 0.0 }
  0x99   : > { %vm365_vm0 = vcmp.gt.f32.partialorder %v333_v37, 0.0  ;;  %vm366_vm1 = vcmp.gt.f32.partialorder %v334_v38, 0.0  ;;  %v397_v54 = vmul.f32 0.2, %v333_v37  ;;  %v398_v55 = vmul.f32 0.2, %v334_v38  ;;  %v290_v57 = vpop.permute.xlu1 %289 }
  0x9a   : > { %v250_v58 = vpop.permute.xlu0 %249  ;;  %v1766_v61 = vadd.f32 %v1674_v48, %v290_v57  ;;  %v352_v12 = vadd.f32 %v1740_v17, %v290_v57  ;;  %v445_v28 = vsel %vm381_vm2, %v349_v35, %v413_v59  ;;  %v446_v30 = vsel %vm382_vm3, %v350_v36, %v414_v60 }
  0x9b   : > { %v335_v63 = vadd.f32 %v1674_v48, %v250_v58  ;;  %v336_v6 = vadd.f32 %v1740_v17, %v250_v58  ;;  %v429_v7 = vsel %vm365_vm0, %v333_v37, %v397_v54  ;;  %v430_v8 = vsel %vm366_vm1, %v334_v38, %v398_v55 }
  0x9c   : > { %vm383_vm4 = vcmp.gt.f32.partialorder %v1766_v61, 0.0  ;;  %v1785_v25 = vadd.f32 %v1679_v1, %v429_v7  ;;  %v1788_v34 = vadd.f32 %v1681_v2, %v430_v8  ;;  %vm384_vm7 = vcmp.gt.f32.partialorder %v352_v12, 0.0 }
  0x9d   : > { %v260_v13 = vpop.permute.xlu1 %259  ;;  %v399_v22 = vmul.f32 0.2, %v335_v63  ;;  %v400_v32 = vmul.f32 0.2, %v336_v6  ;;  %vm367_vm5 = vcmp.gt.f32.partialorder %v335_v63, 0.0  ;;  %vm368_vm6 = vcmp.gt.f32.partialorder %v336_v6, 0.0 }
  0x9e   : > { %v255_v19 = vpop.permute.xlu0 %254  ;;  %v1791_v37 = vadd.f32 %v1674_v48, %v260_v13  ;;  %v1794_v38 = vadd.f32 %v1740_v17, %v260_v13  ;;  %v415_v35 = vmul.f32 0.2, %v1766_v61  ;;  %v416_v50 = vmul.f32 0.2, %v352_v12 }
  0x9f   : > { %v337_v36 = vadd.f32 %v1674_v48, %v255_v19  ;;  %v338_v41 = vadd.f32 %v1740_v17, %v255_v19  ;;  %v629_v2 = vmax.f32 %v1785_v25, %v1788_v34  ;;  %v1802_v51 = vadd.f32 %v1685_v5, %v445_v28 }
  0xa0   : > { %v1805_v53 = vadd.f32 %v1691_v14, %v446_v30  ;;  %v431_v57 = vsel %vm367_vm5, %v335_v63, %v399_v22  ;;  %v432_v58 = vsel %vm368_vm6, %v336_v6, %v400_v32  ;;  %vm371_vm8 = vcmp.gt.f32.partialorder %v1791_v37, 0.0 }
  0xa1   : > { %v300_v1 = vpop.permute.xlu1 %299  ;;  %vm372_vm9 = vcmp.gt.f32.partialorder %v1794_v38, 0.0  ;;  %v403_v5 = vmul.f32 0.2, %v1791_v37  ;;  %v404_v59 = vmul.f32 0.2, %v1794_v38  ;;  %630 = vmax.xlane.f32.xlu0 %v629_v2  ;;  %vm369_vm10 = vcmp.gt.f32.partialorder %v337_v36, 0.0 }
  0xa2   : > { %v295_v45 = vpop.permute.xlu0 %294  ;;  %2261 = vst [vmem:[#allocation5_spill] sm:$0xff] %v1805_v53  ;;  %v1808_v54 = vadd.f32 %v1674_v48, %v300_v1  ;;  %v1811_v55 = vadd.f32 %v1740_v17, %v300_v1  ;;  %vm370_vm11 = vcmp.gt.f32.partialorder %v338_v41, 0.0  ;;  %v401_v62 = vmul.f32 0.2, %v337_v36 }
  0xa3   : > { %v353_v14 = vadd.f32 %v1674_v48, %v295_v45  ;;  %v1821_v60 = vadd.f32 %v1740_v17, %v295_v45  ;;  %v402_v63 = vmul.f32 0.2, %v338_v41  ;;  %v653_v8 = vmax.f32 %v1802_v51, %v1805_v53 }
  0xa4   : > { %v1826_v13 = vadd.f32 %v1683_v3, %v431_v57  ;;  %v1829_v19 = vadd.f32 %v1693_v15, %v432_v58  ;;  %vm387_vm12 = vcmp.gt.f32.partialorder %v1808_v54, 0.0  ;;  %vm388_vm13 = vcmp.gt.f32.partialorder %v1811_v55, 0.0 }
  0xa5   : > { %v270_v7 = vpop.permute.xlu1 %269  ;;  %v419_v30 = vmul.f32 0.2, %v1808_v54  ;;  %v420_v22 = vmul.f32 0.2, %v1811_v55  ;;  %v447_v32 = vsel %vm383_vm4, %v1766_v61, %v415_v35  ;;  %v448_v3 = vsel %vm384_vm7, %v352_v12, %v416_v50  ;;  %654 = vmax.xlane.f32.xlu0 %v653_v8 }
  0xa6   : > { %v265_v6 = vpop.permute.xlu0 %264  ;;  %2262 = vst [vmem:[#allocation6_spill] sm:$0xff] %v1826_v13  ;;  %2263 = vst [vmem:[#allocation7_spill] sm:$0xff] %v1829_v19  ;;  %v1832_v28 = vadd.f32 %v1674_v48, %v270_v7  ;;  %vm385_vm14 = vcmp.gt.f32.partialorder %v353_v14, 0.0  ;;  %vm386_vm15 = vcmp.gt.f32.partialorder %v1821_v60, 0.0  ;;  %v632_v15 = vmax.f32 %v1826_v13, %v1829_v19 }
  0xa7   : > { %v1846_v1 = vadd.f32 %v1740_v17, %v270_v7  ;;  %v417_v45 = vmul.f32 0.2, %v353_v14  ;;  %v418_v2 = vmul.f32 0.2, %v1821_v60  ;;  %v1850_v57 = vadd.f32 %v1674_v48, %v265_v6 }
  0xa8   : > { %v1853_v61 = vadd.f32 %v1740_v17, %v265_v6  ;;  %633 = vmax.xlane.f32.xlu1 %v632_v15  ;;  %v1856_v50 = vmul.f32 0.2, %v1832_v28  ;;  %v1859_v58 = vadd.f32 %v1695_v16, %v447_v32  ;;  %v1862_v7 = vadd.f32 %v1706_v24, %v448_v3 }
  0xa9   : > { %v310_v12 = vpop.permute.xlu1 %309  ;;  %v433_v8 = vsel %vm369_vm10, %v337_v36, %v401_v62  ;;  %v434_v19 = vsel %vm370_vm11, %v338_v41, %v402_v63  ;;  %v1876_v53 = vmul.f32 0.2, %v1846_v1  ;;  %vm373_vm0 = vcmp.gt.f32.partialorder %v1850_v57, 0.0 }
  0xaa   : > { %v305_v35 = vpop.permute.xlu0 %304  ;;  %2264 = vst [vmem:[#allocation8_spill] sm:$0xff] %v1859_v58  ;;  %2265 = vst [vmem:[#allocation9_spill] sm:$0xff] %v1862_v7  ;;  %v1867_v13 = vadd.f32 %v1708_v26, %v433_v8  ;;  %v1870_v6 = vadd.f32 %v1674_v48, %v310_v12  ;;  %v1873_v15 = vadd.f32 %v1740_v17, %v310_v12  ;;  %vm374_vm1 = vcmp.gt.f32.partialorder %v1853_v61, 0.0 }
  0xab   : > { %v656_v16 = vmax.f32 %v1859_v58, %v1862_v7  ;;  %v1881_v24 = vadd.f32 %v1710_v29, %v434_v19  ;;  %v1884_v36 = vadd.f32 %v1674_v48, %v305_v35  ;;  %v405_v26 = vmul.f32 0.2, %v1850_v57 }
  0xac   : > { %2266 = vst [vmem:[#allocation10_spill] sm:$0xff] %v1867_v13  ;;  %v406_v41 = vmul.f32 0.2, %v1853_v61  ;;  %v1893_v32 = vmul.f32 0.2, %v1870_v6  ;;  %v1899_v19 = vadd.f32 %v1740_v17, %v305_v35  ;;  %vm375_vm2 = vcmp.gt.f32.partialorder %v1832_v28, 0.0 }
  0xad   : > { %2267 = vst [vmem:[#allocation11_spill] sm:$0xff] %v1881_v24  ;;  %v280_v62 = vpop.permute.xlu1 %279  ;;  %657 = vmax.xlane.f32.xlu0 %v656_v16  ;;  %v635_v63 = vmax.f32 %v1867_v13, %v1881_v24  ;;  %v1896_v29 = vmul.f32 0.2, %v1873_v15  ;;  %vm376_vm3 = vcmp.gt.f32.partialorder %v1846_v1, 0.0  ;;  %vm389_vm4 = vcmp.gt.f32.partialorder %v1884_v36, 0.0 }
  0xae   : > { %v275_v3 = vpop.permute.xlu0 %274  ;;  %v1905_v12 = vmul.f32 0.2, %v1884_v36  ;;  %v435_v8 = vsel %vm371_vm8, %v1791_v37, %v403_v5  ;;  %v436_v16 = vsel %vm372_vm9, %v1794_v38, %v404_v59  ;;  %v449_v35 = vsel %vm385_vm14, %v353_v14, %v417_v45 }
  0xaf   : > { %636 = vmax.xlane.f32.xlu1 %v635_v63  ;;  %v1915_v24 = vadd.f32 %v1715_v42, %v435_v8  ;;  %v1918_v13 = vadd.f32 %v1717_v43, %v436_v16  ;;  %v450_v7 = vsel %vm386_vm15, %v1821_v60, %v418_v2  ;;  %v1924_v58 = vadd.f32 %v1721_v47, %v449_v35  ;;  %v1391_v2 = vld [vmem:[%s2250_s3 + $0x68] sm:$0xff]  }
  0xb0   : > { %vm391_vm5 = vcmp.gt.f32.partialorder %v1870_v6, 0.0  ;;  %vm392_vm6 = vcmp.gt.f32.partialorder %v1873_v15, 0.0  ;;  %v1929_v37 = vadd.f32 %v1723_v49, %v450_v7  ;;  %v1932_v42 = vadd.f32 %v1674_v48, %v280_v62  ;;  %1267 = vmatprep.subr.bf16.mxu0 %v1391_v2  ;;  %1329 = vmatprep.subr.bf16.mxu1 %v1391_v2 }
  0xb1   : > { %v1935_v43 = vadd.f32 %v1740_v17, %v280_v62  ;;  %v345_v38 = vadd.f32 %v1674_v48, %v275_v3  ;;  %v638_v5 = vmax.f32 %v1915_v24, %v1918_v13  ;;  %v346_v47 = vadd.f32 %v1740_v17, %v275_v3  ;;  %v320_v45 = vpop.permute.xlu1 %319 }
  0xb2   : > { %v451_v59 = vsel %vm387_vm12, %v1808_v54, %v419_v30  ;;  %v452_v49 = vsel %vm388_vm13, %v1811_v55, %v420_v22  ;;  %vm390_vm7 = vcmp.gt.f32.partialorder %v1899_v19, 0.0  ;;  %v422_v14 = vmul.f32 0.2, %v1899_v19  ;;  %v1392_v54 = vld [vmem:[%s2250_s3 + $0x28] sm:$0xff]   ;;  %v315_v22 = vpop.permute.xlu0 %314 }
  0xb3   : > { %v659_v60 = vmax.f32 %v1924_v58, %v1929_v37  ;;  %vm379_vm8 = vcmp.gt.f32.partialorder %v1932_v42, 0.0  ;;  %639 = vmax.xlane.f32.xlu0 %v638_v5  ;;  %vm380_vm9 = vcmp.gt.f32.partialorder %v1935_v43, 0.0  ;;  %v411_v55 = vmul.f32 0.2, %v1932_v42  ;;  %1268 = vmatpush3.bf16.msra.mxu0 %v1392_v54 }
  0xb4   : > { %v412_v30 = vmul.f32 0.2, %v1935_v43  ;;  %vm377_vm10 = vcmp.gt.f32.partialorder %v345_v38, 0.0  ;;  %vm378_vm11 = vcmp.gt.f32.partialorder %v346_v47, 0.0  ;;  %v409_v7 = vmul.f32 0.2, %v345_v38  ;;  %1337 = vmatpush3.bf16.msra.mxu1 %v1392_v54 }
  0xb5   : > { %660 = vmax.xlane.f32.xlu1 %v659_v60  ;;  %v1962_v62 = vadd.f32 %v1726_v52, %v451_v59  ;;  %v1965_v63 = vadd.f32 %v1728_v56, %v452_v49  ;;  %v437_v3 = vsel %vm373_vm0, %v1850_v57, %v405_v26  ;;  %v438_v8 = vsel %vm374_vm1, %v1853_v61, %v406_v41 }
  0xb6   : > { %v1974_v16 = vadd.f32 %v1732_v4, %v437_v3  ;;  %v363_v35 = vadd.f32 %v1674_v48, %v320_v45  ;;  %v364_v52 = vadd.f32 %v1740_v17, %v320_v45  ;;  %v1981_v5 = vadd.f32 %v1742_v0, %v438_v8  ;;  %v1393_v0 = vld [vmem:[%s2250_s3 + $0x60] sm:$0xff]   ;;  %v1398_v8 = vld [vmem:[%s2250_s3 + $0x10] sm:$0xff]  }
  0xb7   : > { %v662_v56 = vmax.f32 %v1962_v62, %v1965_v63  ;;  %v361_v57 = vadd.f32 %v1674_v48, %v315_v22  ;;  %v362_v26 = vadd.f32 %v1740_v17, %v315_v22  ;;  %v410_v61 = vmul.f32 0.2, %v346_v47  ;;  %v1394_v48 = vld [vmem:[%s2250_s3 + $0x20] sm:$0xff]   ;;  %1269 = vmatprep.subr.bf16.mxu0 %v1393_v0  ;;  %1330 = vmatprep.subr.bf16.mxu1 %v1393_v0 }
  0xb8   : > { %v427_v41 = vmul.f32 0.2, %v363_v35  ;;  %v428_v4 = vmul.f32 0.2, %v364_v52  ;;  %v641_v59 = vmax.f32 %v1974_v16, %v1981_v5  ;;  %v439_v60 = vsel %vm375_vm2, %v1832_v28, %v1856_v50  ;;  %1270 = vmatpush3.bf16.msra.mxu0 %v1394_v48  ;;  %1338 = vmatpush3.bf16.msra.mxu1 %v1394_v48 }
  0xb9   : > { %663 = vmax.xlane.f32.xlu0 %v662_v56  ;;  %vm393_vm12 = vcmp.gt.f32.partialorder %v361_v57, 0.0  ;;  %vm394_vm13 = vcmp.gt.f32.partialorder %v362_v26, 0.0  ;;  %v425_v49 = vmul.f32 0.2, %v361_v57  ;;  %v426_v17 = vmul.f32 0.2, %v362_v26 }
  0xba   : > { %v440_v45 = vsel %vm376_vm3, %v1846_v1, %v1876_v53  ;;  %v453_v2 = vsel %vm389_vm4, %v1884_v36, %v1905_v12  ;;  %642 = vmax.xlane.f32.xlu1 %v641_v59  ;;  %v2006_v54 = vadd.f32 %v1744_v9, %v439_v60  ;;  %v454_v28 = vsel %vm390_vm7, %v1899_v19, %v422_v14  ;;  %v1401_v56 = vld [vmem:[%s2250_s3 + $0x40] sm:$0xff]  }
  0xbb   : > { %v2009_v22 = vadd.f32 %v1746_v18, %v440_v45  ;;  %v2015_v50 = vadd.f32 %v1749_v33, %v453_v2  ;;  %v2018_v53 = vadd.f32 %v1751_v39, %v454_v28  ;;  %v455_v1 = vsel %vm391_vm5, %v1870_v6, %v1893_v32  ;;  %v2269_v45 = vld [vmem:[#allocation6_spill] sm:$0xff]  ;;  %v2270_v28 = vld [vmem:[#allocation7_spill] sm:$0xff] }
  0xbc   : > { %v456_v9 = vsel %vm392_vm6, %v1873_v15, %v1896_v29  ;;  %v441_v18 = vsel %vm377_vm10, %v345_v38, %v409_v7  ;;  %v2032_v36 = vadd.f32 %v1753_v44, %v455_v1  ;;  %v442_v19 = vsel %vm378_vm11, %v346_v47, %v410_v61 }
  0xbd   : > { %v644_v33 = vmax.f32 %v2006_v54, %v2009_v22  ;;  %v2035_v39 = vadd.f32 %v1759_v40, %v456_v9  ;;  %v665_v6 = vmax.f32 %v2015_v50, %v2018_v53  ;;  %v2041_v15 = vadd.f32 %v1761_v23, %v441_v18  ;;  %v1395_v23 = vld [vmem:[%s2250_s3 + $0x58] sm:$0xff]  }
  0xbe   : > { %v2044_v32 = vadd.f32 %v1763_v46, %v442_v19  ;;  %v443_v44 = vsel %vm379_vm8, %v1932_v42, %v411_v55  ;;  %vm395_vm14 = vcmp.gt.f32.partialorder %v363_v35, 0.0  ;;  %vm396_vm15 = vcmp.gt.f32.partialorder %v364_v52, 0.0  ;;  %v1396_v46 = vld [vmem:[%s2250_s3 + $0x18] sm:$0xff]   ;;  %1271 = vmatprep.subr.bf16.mxu0 %v1395_v23  ;;  %1331 = vmatprep.subr.bf16.mxu1 %v1395_v23 }
  0xbf   : > { %645 = vmax.xlane.f32.xlu0 %v644_v33  ;;  %v444_v40 = vsel %vm380_vm9, %v1935_v43, %v412_v30  ;;  %v457_v29 = vsel %vm393_vm12, %v361_v57, %v425_v49  ;;  %666 = vmax.xlane.f32.xlu1 %v665_v6  ;;  %v668_v12 = vmax.f32 %v2032_v36, %v2035_v39  ;;  %v596_v30 = vmul.f32 1e+30, %v1779_v27  ;;  %v1402_v57 = vld [vmem:[%s2250_s3] sm:$0xff]   ;;  %v2271_v19 = vld [vmem:[#allocation8_spill] sm:$0xff] }
  0xc0   : > { %v647_v42 = vmax.f32 %v2041_v15, %v2044_v32  ;;  %v458_v38 = vsel %vm394_vm13, %v362_v26, %v426_v17  ;;  %v2065_v43 = vadd.f32 %v1775_v20, %v457_v29  ;;  %v2068_v47 = vadd.f32 %v1770_v10, %v443_v44  ;;  %1272 = vmatpush3.bf16.msra.mxu0 %v1396_v46  ;;  %v2268_v17 = vld [vmem:[#allocation5_spill] sm:$0xff]  ;;  %v2273_v29 = vld [vmem:[#allocation10_spill] sm:$0xff] }
  0xc1   : > { %v2071_v14 = vadd.f32 %v1772_v11, %v444_v40  ;;  %v2074_v55 = vadd.f32 %v1777_v21, %v458_v38  ;;  %v459_v7 = vsel %vm395_vm14, %v363_v35, %v427_v41  ;;  %v460_v3 = vsel %vm396_vm15, %v364_v52, %v428_v4  ;;  %v1397_v11 = vld [vmem:[%s2250_s3 + $0x50] sm:$0xff]   ;;  %1339 = vmatpush3.bf16.msra.mxu1 %v1396_v46  ;;  %v1399_v35 = vld [vmem:[%s2250_s3 + $0x48] sm:$0xff]   ;;  %v2272_v44 = vld [vmem:[#allocation9_spill] sm:$0xff] }
  0xc2   : > { %v2087_v21 = vadd.f32 %v1782_v31, %v459_v7  ;;  %v2089_v27 = vadd.f32 %v596_v30, %v460_v3  ;;  %1273 = vmatprep.subr.bf16.mxu0 %v1397_v11  ;;  %1332 = vmatprep.subr.bf16.mxu1 %v1397_v11  ;;  %v1400_v52 = vld [vmem:[%s2250_s3 + $0x8] sm:$0xff]   ;;  %v2274_v46 = vld [vmem:[#allocation11_spill] sm:$0xff] }
  0xc3   : > { %669 = vmax.xlane.f32.xlu0 %v668_v12  ;;  %648 = vmax.xlane.f32.xlu1 %v647_v42  ;;  %v671_v10 = vmax.f32 %v2065_v43, %v2074_v55  ;;  %v650_v20 = vmax.f32 %v2068_v47, %v2071_v14 }
  0xc4   : > { %1274 = vmatpush3.bf16.msra.mxu0 %v1398_v8  ;;  %v674_v31 = vmax.f32 %v2087_v21, %v2089_v27 }
  0xc5   : > { %1340 = vmatpush3.bf16.msra.mxu1 %v1398_v8  ;;  %1275 = vmatprep.subr.bf16.mxu0 %v1399_v35 }
  0xc6   : > { %1333 = vmatprep.subr.bf16.mxu1 %v1399_v35 }
  0xc7   : > { %651 = vmax.xlane.f32.xlu0 %v650_v20  ;;  %672 = vmax.xlane.f32.xlu1 %v671_v10 }
  0xc8   : > { %1276 = vmatpush3.bf16.msra.mxu0 %v1400_v52 }
  0xc9   : > { %1341 = vmatpush3.bf16.msra.mxu1 %v1400_v52  ;;  %1277 = vmatprep.subr.bf16.mxu0 %v1401_v56 }
  0xca   : > { %1334 = vmatprep.subr.bf16.mxu1 %v1401_v56 }
  0xcb   : > { %675 = vmax.xlane.f32.xlu0 %v674_v31 }
  0xcc   : > { %1278 = vmatpush3.bf16.msra.mxu0 %v1402_v57 }
  0xcd   : > { %1342 = vmatpush3.bf16.msra.mxu1 %v1402_v57 }
 0x12a   : > { %v631_v26 = vpop.xlane.xlu0 %630 }
 0x12b   : > { %v677_v61 = vsub.f32 %v1785_v25, %v631_v26  ;;  %v678_v41 = vsub.f32 %v1788_v34, %v631_v26 }
 0x12d   : > { %v709_v4 = vmul.f32 1.442695, %v677_v61  ;;  %v711_v59 = vmul.f32 1.442695, %v678_v41 }
 0x12e   : > { %v655_v49 = vpop.xlane.xlu0 %654 }
 0x12f   : > { %1403 = vpow2.f32 %v709_v4  ;;  %v693_v0 = vsub.f32 %v1802_v51, %v655_v49  ;;  %v694_v60 = vsub.f32 %v2268_v17, %v655_v49 }
 0x130   : > { %1405 = vpow2.f32 %v711_v59 }
 0x131   : > { %v634_v48 = vpop.xlane.xlu1 %633  ;;  %v741_v9 = vmul.f32 1.442695, %v693_v0  ;;  %v743_v25 = vmul.f32 1.442695, %v694_v60 }
 0x132   : > { %v679_v2 = vsub.f32 %v2269_v45, %v634_v48  ;;  %v680_v1 = vsub.f32 %v2270_v28, %v634_v48 }
 0x133   : > { %1407 = vpow2.f32 %v741_v9 }
 0x134   : > { %v713_v18 = vmul.f32 1.442695, %v679_v2  ;;  %v715_v33 = vmul.f32 1.442695, %v680_v1 }
 0x136   : > { %v658_v34 = vpop.xlane.xlu0 %657  ;;  %1409 = vpow2.f32 %v713_v18 }
 0x137   : > { %v695_v6 = vsub.f32 %v2271_v19, %v658_v34  ;;  %v696_v40 = vsub.f32 %v2272_v44, %v658_v34  ;;  %1411 = vpow2.f32 %v715_v33 }
 0x138   : > { %v637_v51 = vpop.xlane.xlu1 %636  ;;  %1413 = vpow2.f32 %v743_v25 }
 0x139   : > { %v681_v23 = vsub.f32 %v2273_v29, %v637_v51  ;;  %v682_v12 = vsub.f32 %v2274_v46, %v637_v51  ;;  %v745_v42 = vmul.f32 1.442695, %v695_v6  ;;  %v747_v38 = vmul.f32 1.442695, %v696_v40 }
 0x13b   : > { %v717_v30 = vmul.f32 1.442695, %v681_v23  ;;  %v719_v7 = vmul.f32 1.442695, %v682_v12  ;;  %1415 = vpow2.f32 %v745_v42 }
 0x13c   : > { %1417 = vpow2.f32 %v747_v38  ;;  %v640_v3 = vpop.xlane.xlu0 %639  ;;  %v1404_v8 = vpop.eup %1403 }
 0x13d   : > { %1419 = vpow2.f32 %v717_v30  ;;  %v683_v11 = vsub.f32 %v1915_v24, %v640_v3  ;;  %v684_v20 = vsub.f32 %v1918_v13, %v640_v3  ;;  %v1406_v52 = vpop.eup %1405 }
 0x13e   : > { %v661_v10 = vpop.xlane.xlu1 %660  ;;  %1421 = vpow2.f32 %v719_v7  ;;  %v773_v61 = vadd.f32 %v1406_v52, %v1404_v8 }
 0x13f   : > { %v697_v35 = vsub.f32 %v1924_v58, %v661_v10  ;;  %v698_v31 = vsub.f32 %v1929_v37, %v661_v10  ;;  %v721_v56 = vmul.f32 1.442695, %v683_v11  ;;  %v723_v26 = vmul.f32 1.442695, %v684_v20 }
 0x140   : > { %774 = vadd.xlane.f32.xlu1 %v773_v61  ;;  %v2124_v13 = vpop.eup %1407 }
 0x141   : > { %v749_v57 = vmul.f32 1.442695, %v697_v35  ;;  %v751_v41 = vmul.f32 1.442695, %v698_v31  ;;  %1423 = vpow2.f32 %v721_v56 }
 0x142   : > { %v664_v4 = vpop.xlane.xlu0 %663 }
 0x143   : > { %v699_v59 = vsub.f32 %v1962_v62, %v664_v4  ;;  %v700_v24 = vsub.f32 %v1965_v63, %v664_v4  ;;  %1425 = vpow2.f32 %v749_v57  ;;  %v643_v49 = vpop.xlane.xlu1 %642  ;;  %v1410_v58 = vpop.eup %1409 }
 0x144   : > { %1427 = vpow2.f32 %v723_v26  ;;  %v685_v37 = vsub.f32 %v1974_v16, %v643_v49  ;;  %v686_v0 = vsub.f32 %v1981_v5, %v643_v49  ;;  %v1412_v17 = vpop.eup %1411  ;;  %v837_v45 = vpack.c.bf16 %v1410_v58, %v1404_v8 }
 0x145   : > { %v753_v48 = vmul.f32 1.442695, %v699_v59  ;;  %1429 = vpow2.f32 %v751_v41  ;;  %v755_v60 = vmul.f32 1.442695, %v700_v24  ;;  %v776_v63 = vadd.f32 %v1412_v17, %v1410_v58  ;;  %v2128_v28 = vpop.eup %1413 }
 0x146   : > { %v725_v2 = vmul.f32 1.442695, %v685_v37  ;;  %v727_v62 = vmul.f32 1.442695, %v686_v0  ;;  %v838_v9 = vpack.c.bf16 %v1412_v17, %v1406_v52 }
 0x147   : > { %1431 = vpow2.f32 %v753_v48  ;;  %777 = vadd.xlane.f32.xlu0 %v776_v63 }
 0x148   : > { %1433 = vpow2.f32 %v755_v60  ;;  %v646_v1 = vpop.xlane.xlu0 %645  ;;  %v2130_v18 = vpop.eup %1415  ;;  %1013 = vmatprep.mubr.bf16.mxu0 %v838_v9 }
 0x149   : > { %1435 = vpow2.f32 %v725_v2  ;;  %v667_v16 = vpop.xlane.xlu1 %666  ;;  %v687_v5 = vsub.f32 %v2006_v54, %v646_v1  ;;  %v688_v33 = vsub.f32 %v2009_v22, %v646_v1  ;;  %v2134_v25 = vpop.eup %1417  ;;  %v845_v6 = vpack.c.bf16 %v2130_v18, %v2124_v13  ;;  %1014 = vmatmul.mubr.bf16.vlgmr.msra.gmra.mxu0 %v837_v45 }
 0x14a   : > { %1437 = vpow2.f32 %v727_v62  ;;  %v701_v34 = vsub.f32 %v2015_v50, %v667_v16  ;;  %v702_v19 = vsub.f32 %v2018_v53, %v667_v16  ;;  %v1420_v44 = vpop.eup %1419  ;;  %v846_v54 = vpack.c.bf16 %v2134_v25, %v2128_v28 }
 0x14b   : > { %v729_v40 = vmul.f32 1.442695, %v687_v5  ;;  %v1422_v51 = vpop.eup %1421  ;;  %v731_v23 = vmul.f32 1.442695, %v688_v33 }
 0x14c   : > { %v757_v22 = vmul.f32 1.442695, %v701_v34  ;;  %v759_v29 = vmul.f32 1.442695, %v702_v19  ;;  %v670_v46 = vpop.xlane.xlu0 %669  ;;  %v779_v42 = vadd.f32 %v1422_v51, %v1420_v44  ;;  %1045 = vmatprep.mubr.bf16.mxu1 %v846_v54 }
 0x14d   : > { %1439 = vpow2.f32 %v729_v40  ;;  %v649_v12 = vpop.xlane.xlu1 %648  ;;  %v703_v50 = vsub.f32 %v2032_v36, %v670_v46  ;;  %v704_v53 = vsub.f32 %v2035_v39, %v670_v46  ;;  %1046 = vmatmul.mubr.bf16.vlgmr.msra.gmra.mxu1 %v845_v6 }
 0x14e   : > { %1441 = vpow2.f32 %v757_v22  ;;  %v689_v38 = vsub.f32 %v2041_v15, %v649_v12  ;;  %v690_v30 = vsub.f32 %v2044_v32, %v649_v12  ;;  %v1424_v7 = vpop.eup %1423  ;;  %780 = vadd.xlane.f32.xlu1 %v779_v42  ;;  %v797_v22 = vadd.f32 %v2128_v28, %v2124_v13 }
 0x14f   : > { %1443 = vpow2.f32 %v759_v29  ;;  %v761_v3 = vmul.f32 1.442695, %v703_v50  ;;  %v763_v20 = vmul.f32 1.442695, %v704_v53  ;;  %v839_v52 = vpack.c.bf16 %v1424_v7, %v1420_v44 }
 0x150   : > { %1445 = vpow2.f32 %v731_v23  ;;  %v733_v10 = vmul.f32 1.442695, %v689_v38  ;;  %v735_v11 = vmul.f32 1.442695, %v690_v30  ;;  %v652_v8 = vpop.xlane.xlu0 %651  ;;  %v2146_v36 = vpop.eup %1425 }
 0x151   : > { %1447 = vpow2.f32 %v761_v3  ;;  %v673_v39 = vpop.xlane.xlu1 %672  ;;  %v691_v35 = vsub.f32 %v2068_v47, %v652_v8  ;;  %v692_v15 = vsub.f32 %v2071_v14, %v652_v8  ;;  %v1428_v31 = vpop.eup %1427 }
 0x152   : > { %1449 = vpow2.f32 %v733_v10  ;;  %v706_v32 = vsub.f32 %v2074_v55, %v673_v39  ;;  %v2151_v56 = vpop.eup %1429  ;;  %v705_v57 = vsub.f32 %v2065_v43, %v673_v39  ;;  %v840_v61 = vpack.c.bf16 %v1428_v31, %v1422_v51 }
 0x153   : > { %1451 = vpow2.f32 %v735_v11  ;;  %v737_v26 = vmul.f32 1.442695, %v691_v35  ;;  %v739_v59 = vmul.f32 1.442695, %v692_v15  ;;  %v782_v24 = vadd.f32 %v1428_v31, %v1424_v7 }
 0x154   : > { %v2154_v41 = vpop.eup %1431  ;;  %1453 = vpow2.f32 %v763_v20  ;;  %v767_v4 = vmul.f32 1.442695, %v706_v32  ;;  %v676_v47 = vpop.xlane.xlu0 %675  ;;  %1021 = vmatprep.mubr.bf16.mxu0 %v840_v61  ;;  %v765_v48 = vmul.f32 1.442695, %v705_v57  ;;  %v803_v38 = vadd.f32 %v2151_v56, %v2146_v36 }
 0x155   : > { %v2156_v14 = vpop.eup %1433  ;;  %1455 = vpow2.f32 %v737_v26  ;;  %v707_v55 = vsub.f32 %v2087_v21, %v676_v47  ;;  %v708_v49 = vsub.f32 %v2089_v27, %v676_v47  ;;  %v847_v43 = vpack.c.bf16 %v2154_v41, %v2146_v36  ;;  %783 = vadd.xlane.f32.xlu0 %v782_v24  ;;  %1022 = vmatmul.mubr.bf16.gmra.mxu0 %v839_v52 }
 0x156   : > { %v1436_v58 = vpop.eup %1435  ;;  %v848_v37 = vpack.c.bf16 %v2156_v14, %v2151_v56  ;;  %1457 = vpow2.f32 %v767_v4  ;;  %v800_v7 = vadd.f32 %v2134_v25, %v2130_v18  ;;  %v806_v28 = vadd.f32 %v2156_v14, %v2154_v41 }
 0x157   : > { %v1438_v0 = vpop.eup %1437  ;;  %v769_v17 = vmul.f32 1.442695, %v707_v55  ;;  %v771_v60 = vmul.f32 1.442695, %v708_v49  ;;  %1459 = vpow2.f32 %v739_v59 }
 0x158   : > { %v785_v45 = vadd.f32 %v1438_v0, %v1436_v58  ;;  %1053 = vmatprep.mubr.bf16.mxu1 %v848_v37 }
 0x159   : > { %1461 = vpow2.f32 %v769_v17  ;;  %1054 = vmatmul.mubr.bf16.gmra.mxu1 %v847_v43 }
 0x15a   : > { %v1440_v21 = vpop.eup %1439  ;;  %1463 = vpow2.f32 %v771_v60  ;;  %786 = vadd.xlane.f32.xlu1 %v785_v45 }
 0x15b   : > { %v1442_v27 = vpop.eup %1441  ;;  %1465 = vpow2.f32 %v765_v48  ;;  %v841_v63 = vpack.c.bf16 %v1440_v21, %v1436_v58 }
 0x15c   : > { %v1444_v2 = vpop.eup %1443 }
 0x15d   : > { %v1446_v62 = vpop.eup %1445  ;;  %v809_v13 = vadd.f32 %v1444_v2, %v1442_v27 }
 0x15e   : > { %v1448_v1 = vpop.eup %1447  ;;  %v842_v9 = vpack.c.bf16 %v1446_v62, %v1438_v0  ;;  %v788_v16 = vadd.f32 %v1446_v62, %v1440_v21 }
 0x15f   : > { %v1450_v5 = vpop.eup %1449  ;;  %v849_v6 = vpack.c.bf16 %v1448_v1, %v1442_v27 }
 0x160   : > { %v1452_v33 = vpop.eup %1451  ;;  %1029 = vmatprep.mubr.bf16.mxu0 %v842_v9  ;;  %789 = vadd.xlane.f32.xlu0 %v788_v16 }
 0x161   : > { %v1454_v34 = vpop.eup %1453  ;;  %1030 = vmatmul.mubr.bf16.gmra.mxu0 %v841_v63  ;;  %v791_v19 = vadd.f32 %v1452_v33, %v1450_v5 }
 0x162   : > { %v1456_v44 = vpop.eup %1455  ;;  %v850_v40 = vpack.c.bf16 %v1454_v34, %v1444_v2  ;;  %v812_v10 = vadd.f32 %v1454_v34, %v1448_v1 }
 0x163   : > { %792 = vadd.xlane.f32.xlu1 %v791_v19  ;;  %v1458_v54 = vpop.eup %1457  ;;  %v843_v29 = vpack.c.bf16 %v1456_v44, %v1450_v5 }
 0x164   : > { %1061 = vmatprep.mubr.bf16.mxu1 %v850_v40  ;;  %v1460_v51 = vpop.eup %1459 }
 0x165   : > { %1062 = vmatmul.mubr.bf16.gmra.mxu1 %v849_v6  ;;  %v844_v46 = vpack.c.bf16 %v1460_v51, %v1452_v33  ;;  %v794_v12 = vadd.f32 %v1460_v51, %v1456_v44 }
 0x166   : > { %v1462_v23 = vpop.eup %1461 }
 0x167   : > { %v1464_v50 = vpop.eup %1463  ;;  %798 = vadd.xlane.f32.xlu1 %v797_v22  ;;  %1037 = vmatprep.mubr.bf16.mxu0 %v844_v46 }
 0x168   : > { %v1466_v53 = vpop.eup %1465  ;;  %795 = vadd.xlane.f32.xlu0 %v794_v12  ;;  %v852_v42 = vpack.c.bf16 %v1464_v50, %v1458_v54  ;;  %v818_v11 = vadd.f32 %v1464_v50, %v1462_v23 }
 0x169   : > { %1038 = vmatmul.mubr.bf16.gmra.mxu0 %v843_v29  ;;  %v851_v30 = vpack.c.bf16 %v1462_v23, %v1466_v53  ;;  %v815_v3 = vadd.f32 %v1466_v53, %v1458_v54 }
 0x16a   : > { %1069 = vmatprep.mubr.bf16.mxu1 %v852_v42 }
 0x16b   : > { %804 = vadd.xlane.f32.xlu1 %v803_v38 }
 0x16c   : > { %801 = vadd.xlane.f32.xlu0 %v800_v7 }
 0x16d   : > { %1070 = vmatmul.mubr.bf16.gmra.mxu1 %v851_v30 }
 0x16f   : > { %810 = vadd.xlane.f32.xlu1 %v809_v13 }
 0x170   : > { %807 = vadd.xlane.f32.xlu0 %v806_v28 }
 0x173   : > { %816 = vadd.xlane.f32.xlu1 %v815_v3 }
 0x174   : > { %813 = vadd.xlane.f32.xlu0 %v812_v10 }
 0x178   : > { %819 = vadd.xlane.f32.xlu0 %v818_v11 }
 0x1c9   : > { %v775_v20 = vpop.xlane.xlu1 %774 }
 0x1ca   : > { %1467 = vrcp.f32 %v775_v20 }
 0x1d0   : > { %v778_v18 = vpop.xlane.xlu0 %777 }
 0x1d7   : > { %v781_v25 = vpop.xlane.xlu1 %780  ;;  %v1468_v41 = vpop.eup %1467 }
 0x1de   : > { %v784_v8 = vpop.xlane.xlu0 %783 }
 0x1e3   : > { %v787_v36 = vpop.xlane.xlu1 %786 }
 0x1e9   : > { %v790_v39 = vpop.xlane.xlu0 %789 }
 0x1ec   : > { %v793_v35 = vpop.xlane.xlu1 %792 }
 0x1f0   : > { %v799_v31 = vpop.xlane.xlu1 %798 }
 0x1f1   : > { %v2172_v15 = vpop.xlane.xlu0 %795  ;;  %1469 = vrcp.f32 %v799_v31 }
 0x1f2   : > { %1471 = vrcp.f32 %v778_v18 }
 0x1f4   : > { %v805_v56 = vpop.xlane.xlu1 %804 }
 0x1f5   : > { %v802_v32 = vpop.xlane.xlu0 %801 }
 0x1f6   : > { %1473 = vrcp.f32 %v802_v32 }
 0x1f7   : > { %1475 = vrcp.f32 %v781_v25 }
 0x1f8   : > { %1477 = vrcp.f32 %v805_v56  ;;  %v811_v62 = vpop.xlane.xlu1 %810 }
 0x1f9   : > { %1479 = vrcp.f32 %v784_v8  ;;  %v808_v24 = vpop.xlane.xlu0 %807 }
 0x1fa   : > { %1481 = vrcp.f32 %v808_v24 }
 0x1fb   : > { %1483 = vrcp.f32 %v787_v36 }
 0x1fc   : > { %1485 = vrcp.f32 %v790_v39  ;;  %v817_v50 = vpop.xlane.xlu1 %816 }
 0x1fd   : > { %1487 = vrcp.f32 %v811_v62  ;;  %v814_v44 = vpop.xlane.xlu0 %813 }
 0x1fe   : > { %v1470_v49 = vpop.eup %1469  ;;  %1489 = vrcp.f32 %v793_v35 }
 0x1ff   : > { %v1472_v37 = vpop.eup %1471  ;;  %1491 = vrcp.f32 %v814_v44 }
 0x200   : > { %1493 = vrcp.f32 %v2172_v15 }
 0x201   : > { %1495 = vrcp.f32 %v817_v50  ;;  %v820_v30 = vpop.xlane.xlu0 %819 }
 0x202   : > { %1497 = vrcp.f32 %v820_v30 }
 0x203   : > { %v1474_v45 = vpop.eup %1473 }
 0x204   : > { %v1476_v9 = vpop.eup %1475 }
 0x205   : > { %v1478_v6 = vpop.eup %1477 }
 0x206   : > { %v1480_v51 = vpop.eup %1479 }
 0x207   : > { %v1482_v12 = vpop.eup %1481 }
 0x208   : > { %v1484_v13 = vpop.eup %1483 }
 0x209   : > { %v1279_v52 = vpop.f32.mrf.mxu0  ;;  %v1486_v18 = vpop.eup %1485 }
 0x20a   : > { %v1488_v36 = vpop.eup %1487 }
 0x20b   : > { %v1280_v57 = vpop.f32.mrf.mxu0  ;;  %v1490_v56 = vpop.eup %1489 }
 0x20c   : > { %v1281_v26 = vadd.f32 %v1280_v57, %v1279_v52 }
 0x20d   : > { %v1303_v61 = vpop.f32.mrf.mxu1  ;;  %v1282_v4 = vpop.f32.mrf.mxu0 }
 0x20e   : > { %v1078_v59 = vmul.f32 %v1468_v41, %v1281_v26 }
 0x20f   : > { %v1304_v47 = vpop.f32.mrf.mxu1  ;;  %v1283_v14 = vpop.f32.mrf.mxu0 }
 0x210   : > { %v1305_v55 = vadd.f32 %v1304_v47, %v1303_v61  ;;  %1094 = vst [vmem:[%s2177_s13] sm:$0xff] %v1078_v59  ;;  %v1284_v43 = vadd.f32 %v1283_v14, %v1282_v4  ;;  %v1492_v61 = vpop.eup %1491 }
 0x211   : > { %v1306_v58 = vpop.f32.mrf.mxu1 }
 0x212   : > { %v1086_v0 = vmul.f32 %v1470_v49, %v1305_v55  ;;  %v1079_v48 = vmul.f32 %v1472_v37, %v1284_v43  ;;  %v1494_v55 = vpop.eup %1493 }
 0x213   : > { %v1307_v17 = vpop.f32.mrf.mxu1 }
 0x214   : > { %1102 = vst [vmem:[%s2177_s13 + $0x40] sm:$0xff] %v1086_v0  ;;  %v1308_v60 = vadd.f32 %v1307_v17, %v1306_v58  ;;  %1095 = vst [vmem:[%s2177_s13 + $0x8] sm:$0xff] %v1079_v48  ;;  %v1496_v58 = vpop.eup %1495 }
 0x215   : > { %v1285_v21 = vpop.f32.mrf.mxu0 }
 0x216   : > { %v1087_v27 = vmul.f32 %v1474_v45, %v1308_v60  ;;  %v1498_v45 = vpop.eup %1497 }
 0x217   : > { %v1286_v2 = vpop.f32.mrf.mxu0 }
 0x218   : > { %v1287_v63 = vadd.f32 %v1286_v2, %v1285_v21  ;;  %1103 = vst [vmem:[%s2177_s13 + $0x48] sm:$0xff] %v1087_v27 }
 0x219   : > { %v1309_v1 = vpop.f32.mrf.mxu1  ;;  %v1288_v16 = vpop.f32.mrf.mxu0 }
 0x21a   : > { %v1080_v5 = vmul.f32 %v1476_v9, %v1287_v63 }
 0x21b   : > { %v1310_v33 = vpop.f32.mrf.mxu1  ;;  %v1289_v34 = vpop.f32.mrf.mxu0 }
 0x21c   : > { %v1311_v19 = vadd.f32 %v1310_v33, %v1309_v1  ;;  %1096 = vst [vmem:[%s2177_s13 + $0x10] sm:$0xff] %v1080_v5  ;;  %v1290_v40 = vadd.f32 %v1289_v34, %v1288_v16 }
 0x21d   : > { %v1312_v54 = vpop.f32.mrf.mxu1 }
 0x21e   : > { %v1088_v22 = vmul.f32 %v1478_v6, %v1311_v19  ;;  %v1081_v29 = vmul.f32 %v1480_v51, %v1290_v40 }
 0x21f   : > { %v1313_v23 = vpop.f32.mrf.mxu1 }
 0x220   : > { %1104 = vst [vmem:[%s2177_s13 + $0x50] sm:$0xff] %v1088_v22  ;;  %v1314_v46 = vadd.f32 %v1313_v23, %v1312_v54  ;;  %1097 = vst [vmem:[%s2177_s13 + $0x18] sm:$0xff] %v1081_v29 }
 0x221   : > { %v1291_v53 = vpop.f32.mrf.mxu0 }
 0x222   : > { %v1089_v42 = vmul.f32 %v1482_v12, %v1314_v46 }
 0x223   : > { %v1292_v38 = vpop.f32.mrf.mxu0 }
 0x224   : > { %v1293_v7 = vadd.f32 %v1292_v38, %v1291_v53  ;;  %1105 = vst [vmem:[%s2177_s13 + $0x58] sm:$0xff] %v1089_v42 }
 0x225   : > { %v1294_v28 = vpop.f32.mrf.mxu0  ;;  %v1315_v3 = vpop.f32.mrf.mxu1 }
 0x226   : > { %v1082_v10 = vmul.f32 %v1484_v13, %v1293_v7 }
 0x227   : > { %v1295_v11 = vpop.f32.mrf.mxu0  ;;  %v1316_v20 = vpop.f32.mrf.mxu1 }
 0x228   : > { %1098 = vst [vmem:[%s2177_s13 + $0x20] sm:$0xff] %v1082_v10  ;;  %v1296_v25 = vadd.f32 %v1295_v11, %v1294_v28  ;;  %v1317_v8 = vadd.f32 %v1316_v20, %v1315_v3 }
 0x229   : > { %v1297_v39 = vpop.f32.mrf.mxu0  ;;  %v1318_v35 = vpop.f32.mrf.mxu1 }
 0x22a   : > { %v1083_v15 = vmul.f32 %v1486_v18, %v1296_v25  ;;  %v1090_v31 = vmul.f32 %v1488_v36, %v1317_v8 }
 0x22b   : > { %v1298_v32 = vpop.f32.mrf.mxu0  ;;  %v1319_v52 = vpop.f32.mrf.mxu1 }
 0x22c   : > { %1099 = vst [vmem:[%s2177_s13 + $0x28] sm:$0xff] %v1083_v15  ;;  %1106 = vst [vmem:[%s2177_s13 + $0x60] sm:$0xff] %v1090_v31  ;;  %v1299_v57 = vadd.f32 %v1298_v32, %v1297_v39  ;;  %v1320_v26 = vadd.f32 %v1319_v52, %v1318_v35 }
 0x22d   : > { %v1300_v41 = vpop.f32.mrf.mxu0  ;;  %v1321_v4 = vpop.f32.mrf.mxu1 }
 0x22e   : > { %v1084_v59 = vmul.f32 %v1490_v56, %v1299_v57  ;;  %v1091_v47 = vmul.f32 %v1492_v61, %v1320_v26 }
 0x22f   : > { %v1301_v24 = vpop.f32.mrf.mxu0  ;;  %v1322_v14 = vpop.f32.mrf.mxu1 }
 0x230   : > { %1100 = vst [vmem:[%s2177_s13 + $0x30] sm:$0xff] %v1084_v59  ;;  %1107 = vst [vmem:[%s2177_s13 + $0x68] sm:$0xff] %v1091_v47  ;;  %v1302_v49 = vadd.f32 %v1301_v24, %v1300_v41  ;;  %v1323_v43 = vadd.f32 %v1322_v14, %v1321_v4 }
 0x231   : > { %v1324_v37 = vpop.f32.mrf.mxu1 }
 0x232   : > { %v1085_v0 = vmul.f32 %v1494_v55, %v1302_v49  ;;  %v1092_v48 = vmul.f32 %v1496_v58, %v1323_v43 }
 0x233   : > { %v1325_v17 = vpop.f32.mrf.mxu1 }
 0x234   : > { %1101 = vst [vmem:[%s2177_s13 + $0x38] sm:$0xff] %v1085_v0  ;;  %1108 = vst [vmem:[%s2177_s13 + $0x70] sm:$0xff] %v1092_v48  ;;  %v1326_v60 = vadd.f32 %v1325_v17, %v1324_v37 }
 0x236   : > { %v1093_v21 = vmul.f32 %v1498_v45, %v1326_v60 }
 0x238   : > { %1109 = vst [vmem:[%s2177_s13 + $0x78] sm:$0xff] %v1093_v21 }
 0x239   : > { %1512 = shalt.err (!%p1509_p4)
}
 0x23a   : > { %s1513_s6 = scalar_lea.hbm %s2200_s27, 2048  ;;  %s1517_s9 = scalar_lea.hbm %s2251_s4, 4096 }
 0x23b   : > { %p1514_p7 = scmp.ne.s32.totalorder %s2200_s27, %s1513_s6  ;;  %p1518_p10 = scmp.lt.s32.totalorder %s2200_s27, %s2251_s4 }
 0x23c   : > { %p1519_p11 = scmp.lt.s32.totalorder %s1517_s9, %s1513_s6 }
 0x23d   : > { %p1515_p8 = pnand %p1514_p7, %p1628_p5 }
 0x23e   : > { %p1520_p12 = por %p1519_p11, %p1518_p10 }
 0x23f   : > { %p1516_p9 = pneg %p1515_p8 }
 0x241   : > { %p1521_p13 = pnand %p1520_p12, %p1516_p9 }
 0x243   : > { %1524 = shalt.err (!%p1521_p13)
}
 0x244   : > { %s1563_s12 = smov 128   ;;  %s1564_s13 = smov 8  }
 0x245   : > { %1343 = dma.vmem_to_hbm [thread:$0]  (%p1628_p5), %s2202_s20, 2048, %s2200_s27, %s2207_s19, %s1563_s12, %s1563_s12, %s1564_s13  }
 0x246 PF: > { %p1349_p0 = scmp.ge.s32.totalorder %s1559_s18, 2  ;;  %s1139_s14 = sand.u32 1, %s1547_s15  }
 0x247   : > { %s1140_s22 = scalar_lea.sflag [#allocation3], %s1139_s14 }
 0x248   : > { %p1346_p1 = pnand %p1349_p0, %p1632_p6 }
 0x24a   : > { %p1347_p2 = pneg %p1346_p1 }
 0x24c   : > { %1542 = dma.done.wait (%p1347_p2), %s1140_s22, 2048  }
 0x24d   : > { %1544 = vsyncadd (%p1347_p2), %s1140_s22, 4294965248  ;;  %p14_p3 = scmp.ge.s32.totalorder %s1615_s21, 4   ;;  %s2275_s15 = smov %s1551_s16 }
 0x24e   : > { %s2276_s16 = smov %s1555_s17  ;;  %s2277_s17 = smov %s1626_s24 }
 0x24f   : > { %s2278_s18 = smov %s1615_s21  ;;  %16 = sbr.rel (!%p14_p3) target bundleno = 3 (0x3), region = 74 }
 0x254   :  { %1145 = vsyncpa [#allocation3], 1 }
 0x255   :  { %1147 = vsyncpa [#allocation3 + $0x1], 1 }

</bundles_post_ra>
